<compile_context>
chip_gen: v7x
topology: tpu7x:2x2x1
jax: 0.10.0
libtpu: 0.0.40
codegen_flags: <defaults>
</compile_context>

<pallas_src>
import jax
import jax.numpy as jnp
import numpy as np
from jax.experimental import pallas as pl
from jax.experimental.pallas import tpu as pltpu


def _round_up(x, m):
    return (x + m - 1) // m * m


def _mf_kernel(uid_ref, iid_ref,          # (1, TB) int32 VMEM blocks of the id vectors
               uembT_ref, iembT_ref,      # VMEM-resident extended tables: (D+2, Nu), (D+2, Ni)
               gbias_ref,                 # SMEM (1,) f32 global bias
               out_ref):                  # (1, TB) f32 lane-dense output block
    tb = uid_ref.shape[1]
    dp2 = uembT_ref.shape[0]              # D + 2 (bias row + ones row folded in)
    n_users = uembT_ref.shape[1]
    n_items = iembT_ref.shape[1]

    uids = uid_ref[...]                   # (1, TB) int32
    iids = iid_ref[...]                   # (1, TB) int32

    # One-hot selection matrices, (N, TB): oh[n, b] = 1.0 iff ids[b] == n.
    oh_u = (jax.lax.broadcasted_iota(jnp.int32, (n_users, tb), 0) == uids
            ).astype(jnp.float32)
    oh_i = (jax.lax.broadcasted_iota(jnp.int32, (n_items, tb), 0) == iids
            ).astype(jnp.float32)

    # Batched row gather on the MXU: (D+2, N) @ (N, TB) -> (D+2, TB).
    # Rows 0..D-1 are the embeddings, row D / D+1 carry bias-and-ones so the
    # bias lookups ride along for free.
    ug = jnp.dot(uembT_ref[...], oh_u, preferred_element_type=jnp.float32)
    ig = jnp.dot(iembT_ref[...], oh_i, preferred_element_type=jnp.float32)

    # Fused dot-product + bias reduction: sum over D+2 rows of ug*ig equals
    # dot(u,v) + user_bias + item_bias.  Done as a ones-row matmul so the
    # cross-sublane reduction runs on the (otherwise idle) MXU, not the XLU.
    ones_row = jnp.ones((1, dp2), jnp.float32)
    pred = jnp.dot(ones_row, ug * ig, preferred_element_type=jnp.float32)  # (1, TB)

    out_ref[...] = jax.nn.sigmoid(pred + gbias_ref[0])   # full-width lane-dense store


def prepare_mf_tables(user_emb, item_emb, user_bias, item_bias):
    """One-time layout prep (keep OUT of the hot path / call once per params):

    Returns feature-major tables with bias + ones rows folded in, columns
    padded to a multiple of 8 (sublane-friendly one-hot contraction dim).
    """
    n_users, D = user_emb.shape
    n_items = item_emb.shape[0]
    nu_pad = _round_up(n_users, 8)
    ni_pad = _round_up(n_items, 8)

    u = jnp.zeros((D + 2, nu_pad), jnp.float32)
    u = u.at[:D, :n_users].set(jnp.asarray(user_emb, jnp.float32).T)
    u = u.at[D, :n_users].set(jnp.asarray(user_bias, jnp.float32).reshape(n_users))
    u = u.at[D + 1, :n_users].set(1.0)

    i = jnp.zeros((D + 2, ni_pad), jnp.float32)
    i = i.at[:D, :n_items].set(jnp.asarray(item_emb, jnp.float32).T)
    i = i.at[D, :n_items].set(1.0)
    i = i.at[D + 1, :n_items].set(jnp.asarray(item_bias, jnp.float32).reshape(n_items))
    return u, i


def matrix_factorization_forward(user_ids, item_ids,
                                 uembT_ext, iembT_ext, global_bias,
                                 *, max_tile_b=2048):
    """Pallas implementation of MatrixFactorization.forward (use_bias=True).

    `uembT_ext` / `iembT_ext` come from `prepare_mf_tables` (done once, not per
    call).
    """
    B = int(user_ids.shape[0])
    Dp2, nu_pad = uembT_ext.shape
    ni_pad = iembT_ext.shape[1]

    LANE = 128
    # <= ~48 MiB: leaves headroom on v7x (64 MiB physical VMEM per TC) while
    # raising the 32 MiB scoped default on v5e/v6e for bigger batch tiles.
    VMEM_LIMIT = 48 * 1024 * 1024

    # Batch tile: multiple of 128 lanes, up to max_tile_b ids per grid step.
    b_lanes = _round_up(B, LANE)
    tile_b = min(max_tile_b, b_lanes)

    # v7x has 2 TensorCores; with a single grid step the second core idles.
    # Split the batch into >= 2 tiles whenever it spans more than one lane tile.
    if b_lanes > LANE and b_lanes // tile_b < 2:
        tile_b = min(tile_b, _round_up(-(-b_lanes // 2), LANE))

    # VMEM budget: resident tables + (double-buffered-ish) per-step temporaries
    # (two one-hots + two gathered tiles).  Shrink the tile until it fits.
    resident = 4 * Dp2 * (_round_up(nu_pad, LANE) + _round_up(ni_pad, LANE))

    def _step_bytes(tb):
        return 4 * tb * (nu_pad + ni_pad + 2 * Dp2)

    while tile_b > LANE and resident + 2 * _step_bytes(tile_b) > int(0.8 * VMEM_LIMIT):
        tile_b -= LANE

    B_pad = _round_up(B, tile_b)
    num_tiles = B_pad // tile_b
    pad = B_pad - B

    # Pad ids with 0 (a valid row); padded predictions are sliced off below.
    uid = jnp.pad(user_ids.astype(jnp.int32), (0, pad)).reshape(1, B_pad)
    iid = jnp.pad(item_ids.astype(jnp.int32), (0, pad)).reshape(1, B_pad)
    gbias = jnp.asarray(global_bias, jnp.float32).reshape(1)

    grid_spec = pltpu.PrefetchScalarGridSpec(
        num_scalar_prefetch=0,
        grid=(num_tiles,),
        in_specs=[
            pl.BlockSpec((1, tile_b), lambda t: (0, t)),          # user ids tile
            pl.BlockSpec((1, tile_b), lambda t: (0, t)),          # item ids tile
            pl.BlockSpec(memory_space=pltpu.MemorySpace.VMEM),    # user table (resident)
            pl.BlockSpec(memory_space=pltpu.MemorySpace.VMEM),    # item table (resident)
            pl.BlockSpec(memory_space=pltpu.MemorySpace.SMEM),    # global bias scalar
        ],
        out_specs=pl.BlockSpec((1, tile_b), lambda t: (0, t)),    # lane-dense output slab
    )

    out = pl.pallas_call(
        _mf_kernel,
        out_shape=jax.ShapeDtypeStruct((1, B_pad), jnp.float32),
        grid_spec=grid_spec,
        compiler_params=pltpu.CompilerParams(
            dimension_semantics=("parallel",),   # batch tiles are independent (v7x: 2 TCs)
            vmem_limit_bytes=VMEM_LIMIT,
        ),
    )(uid, iid, uembT_ext, iembT_ext, gbias)

    return out.reshape(B_pad)[:B]


def _reference(user_ids, item_ids, user_emb, item_emb, user_bias, item_bias, global_bias):
    u = user_emb[user_ids]
    v = item_emb[item_ids]
    pred = (jnp.sum(u * v, axis=1)
            + user_bias[user_ids] + item_bias[item_ids] + global_bias[0])
    return jax.nn.sigmoid(pred)


if __name__ == "__main__":
    n_users, n_items, embedding_dim, batch = 64, 96, 128, 8

    key = jax.random.PRNGKey(0)
    k1, k2, k3, k4, k5, k6 = jax.random.split(key, 6)

    # Deterministic parameter init (same shapes as the nn.Module).
    # nn.Embedding weights: normal(std=0.01), per _init_weights.
    user_emb = (0.01 * jax.random.normal(k1, (n_users, embedding_dim))).astype(jnp.float32)
    item_emb = (0.01 * jax.random.normal(k2, (n_items, embedding_dim))).astype(jnp.float32)
    # The PyTorch module zero-inits biases; small deterministic randoms are used
    # here so the bias path is actually exercised numerically.
    user_bias = (0.01 * jax.random.normal(k3, (n_users,))).astype(jnp.float32)
    item_bias = (0.01 * jax.random.normal(k4, (n_items,))).astype(jnp.float32)
    global_bias = jnp.full((1,), 0.05, dtype=jnp.float32)

    user_ids = jax.random.randint(k5, (batch,), 0, n_users, dtype=jnp.int32)
    item_ids = jax.random.randint(k6, (batch,), 0, n_items, dtype=jnp.int32)

    # One-time layout prep (feature-major, biases folded in) — off the hot path.
    uembT_ext, iembT_ext = prepare_mf_tables(user_emb, item_emb, user_bias, item_bias)

    out = matrix_factorization_forward(user_ids, item_ids,
                                       uembT_ext, iembT_ext, global_bias)
    out = jax.block_until_ready(out)

    ref = _reference(user_ids, item_ids, user_emb, item_emb,
                     user_bias, item_bias, global_bias)
    np.testing.assert_allclose(np.asarray(out), np.asarray(ref), rtol=1e-4, atol=1e-6)

    print("KERNEL_OK")
</pallas_src>

<mosaic_0001>
module attributes {stable_mosaic.version = 11 : i64} {
  func.func @_mf_kernel(%arg0: i32, %arg1: memref<1x128xi32, #tpu.memory_space<vmem>>, %arg2: memref<1x128xi32, #tpu.memory_space<vmem>>, %arg3: memref<130x64xf32, #tpu.memory_space<vmem>>, %arg4: memref<130x96xf32, #tpu.memory_space<vmem>>, %arg5: memref<1xf32, #tpu.memory_space<smem>>, %arg6: memref<1x128xf32, #tpu.memory_space<vmem>>) attributes {dimension_semantics = [#tpu.dimension_semantics<parallel>], iteration_bounds = array<i64: 1>, scalar_prefetch = 0 : i64, scratch_operands = 0 : i64, tpu.core_type = #tpu.core_type<tc>, window_params = [{transform_indices = @transform_0, window_bounds = array<i64: 1, 128>}, {transform_indices = @transform_1, window_bounds = array<i64: 1, 128>}, {pipeline_mode = #tpu.pipeline_mode<synchronous>, transform_indices = @transform_2, window_bounds = array<i64: 130, 64>}, {pipeline_mode = #tpu.pipeline_mode<synchronous>, transform_indices = @transform_3, window_bounds = array<i64: 130, 96>}, {transform_indices = @transform_4, window_bounds = array<i64: 1>}, {transform_indices = @transform_5, window_bounds = array<i64: 1, 128>}]} {
    %c0 = arith.constant 0 : index
    %c0_0 = arith.constant 0 : index
    %0 = vector.load %arg1[%c0, %c0_0] : memref<1x128xi32, #tpu.memory_space<vmem>>, vector<1x128xi32>
    %c0_1 = arith.constant 0 : index
    %c0_2 = arith.constant 0 : index
    %1 = vector.load %arg2[%c0_1, %c0_2] : memref<1x128xi32, #tpu.memory_space<vmem>>, vector<1x128xi32>
    %2 = tpu.iota {dimensions = array<i32: 0>} : vector<64x128xi32>
    %3 = vector.broadcast %0 : vector<1x128xi32> to vector<64x128xi32>
    %4 = arith.cmpi eq, %2, %3 : vector<64x128xi32>
    %5 = arith.extui %4 : vector<64x128xi1> to vector<64x128xi32>
    %6 = arith.sitofp %5 : vector<64x128xi32> to vector<64x128xf32>
    %7 = tpu.iota {dimensions = array<i32: 0>} : vector<96x128xi32>
    %8 = vector.broadcast %1 : vector<1x128xi32> to vector<96x128xi32>
    %9 = arith.cmpi eq, %7, %8 : vector<96x128xi32>
    %10 = arith.extui %9 : vector<96x128xi1> to vector<96x128xi32>
    %11 = arith.sitofp %10 : vector<96x128xi32> to vector<96x128xf32>
    %c0_3 = arith.constant 0 : index
    %c0_4 = arith.constant 0 : index
    %12 = vector.load %arg3[%c0_3, %c0_4] : memref<130x64xf32, #tpu.memory_space<vmem>>, vector<130x64xf32>
    %cst = arith.constant dense<0.000000e+00> : vector<130x128xf32>
    %13 = tpu.matmul %12, %6, %cst {dimension_numbers = #tpu.dot_dimension_numbers<[1], [0], [0], [1], [0, 0, 1, 1], [], []>} : vector<130x64xf32>, vector<64x128xf32>, vector<130x128xf32> -> vector<130x128xf32>
    %c0_5 = arith.constant 0 : index
    %c0_6 = arith.constant 0 : index
    %14 = vector.load %arg4[%c0_5, %c0_6] : memref<130x96xf32, #tpu.memory_space<vmem>>, vector<130x96xf32>
    %cst_7 = arith.constant dense<0.000000e+00> : vector<130x128xf32>
    %15 = tpu.matmul %14, %11, %cst_7 {dimension_numbers = #tpu.dot_dimension_numbers<[1], [0], [0], [1], [0, 0, 1, 1], [], []>} : vector<130x96xf32>, vector<96x128xf32>, vector<130x128xf32> -> vector<130x128xf32>
    %cst_8 = arith.constant 1.000000e+00 : f32
    %16 = vector.broadcast %cst_8 : f32 to vector<1x130xf32>
    %17 = arith.mulf %13, %15 : vector<130x128xf32>
    %cst_9 = arith.constant dense<0.000000e+00> : vector<1x128xf32>
    %18 = tpu.matmul %16, %17, %cst_9 {dimension_numbers = #tpu.dot_dimension_numbers<[1], [0], [0], [1], [0, 0, 1, 1], [], []>} : vector<1x130xf32>, vector<130x128xf32>, vector<1x128xf32> -> vector<1x128xf32>
    %c0_10 = arith.constant 0 : index
    %19 = memref.load %arg5[%c0_10] : memref<1xf32, #tpu.memory_space<smem>>
    %20 = vector.broadcast %19 : f32 to vector<1x128xf32>
    %21 = arith.addf %18, %20 : vector<1x128xf32>
    %22 = arith.negf %21 : vector<1x128xf32>
    %23 = math.exp %22 : vector<1x128xf32>
    %cst_11 = arith.constant 1.000000e+00 : f32
    %24 = vector.broadcast %cst_11 : f32 to vector<1x128xf32>
    %25 = arith.addf %24, %23 : vector<1x128xf32>
    %26 = arith.divf %24, %25 : vector<1x128xf32>
    %c0_12 = arith.constant 0 : index
    %c0_13 = arith.constant 0 : index
    %27 = vector.load %arg6[%c0_12, %c0_13] : memref<1x128xf32, #tpu.memory_space<vmem>>, vector<1x128xf32>
    tpu.vector_store %arg6[%c0_12, %c0_13], %26 {strides = array<i32>} : memref<1x128xf32, #tpu.memory_space<vmem>>, vector<1x128xf32>,
    return
  }
  func.func @transform_0(%arg0: i32) -> (i32, i32) {
    %c0_i32 = arith.constant 0 : i32
    %c0_i32_0 = arith.constant 0 : i32
    return %c0_i32, %arg0 : i32, i32
  }
  func.func @transform_1(%arg0: i32) -> (i32, i32) {
    %c0_i32 = arith.constant 0 : i32
    %c0_i32_0 = arith.constant 0 : i32
    return %c0_i32, %arg0 : i32, i32
  }
  func.func @transform_2(%arg0: i32) -> (i32, i32) {
    %c0_i32 = arith.constant 0 : i32
    %c0_i32_0 = arith.constant 0 : i32
    %c0_i32_1 = arith.constant 0 : i32
    return %c0_i32, %c0_i32_0 : i32, i32
  }
  func.func @transform_3(%arg0: i32) -> (i32, i32) {
    %c0_i32 = arith.constant 0 : i32
    %c0_i32_0 = arith.constant 0 : i32
    %c0_i32_1 = arith.constant 0 : i32
    return %c0_i32, %c0_i32_0 : i32, i32
  }
  func.func @transform_4(%arg0: i32) -> i32 {
    %c0_i32 = arith.constant 0 : i32
    %c0_i32_0 = arith.constant 0 : i32
    return %c0_i32 : i32
  }
  func.func @transform_5(%arg0: i32) -> (i32, i32) {
    %c0_i32 = arith.constant 0 : i32
    %c0_i32_0 = arith.constant 0 : i32
    return %c0_i32, %arg0 : i32, i32
  }
}

</mosaic_0001>

<bundles_post_ra>
// kernel: tpu_custom_call.1
= control target key start
LH: loop header
LB: loop body
LE: loop exit
PB: predicated region body
PF: predicated region fallthrough
CT: control target
= control target key end

     0   :  { %v24_v0 = vlaneseq  ;;  %v1024_v1 = vmov 0.0|0.0   ;;  %vm1025_vm0 = vmmov 0   ;;  %v1026_v5 = vmov 0.0   ;;  %s1320_s0 = inlined_call_operand.vmem [shape: s32[1,128], index: 0, kind: input, shape index: {}]   ;;  %s1321_s1 = inlined_call_operand.vmem [shape: s32[1,128], index: 1, kind: input, shape index: {}]   ;;  %s1322_s2 = inlined_call_operand.vmem [shape: f32[130,64], index: 2, kind: input, shape index: {}]   ;;  %s1323_s3 = inlined_call_operand.vmem [shape: f32[130,96], index: 3, kind: input, shape index: {}]   ;;  %s1324_s4 = inlined_call_operand.<no memory space> [shape: f32[1], index: 4, kind: input, shape index: {}]   ;;  %s1325_s5 = inlined_call_operand.hbm [shape: f32[1,128], index: 5, kind: output, shape index: {}]  }
   0x1   :  { %948 = vmatprep.subr.bf16.mxu1 %v1024_v1  ;;  %v1064_v2 = vld [vmem:[%s1321_s1] ss:$0 sm:$0xff]  ;;  %936 = vmatprep.subr.bf16.mxu0 %v1024_v1  ;;  %v1027_v11 = vmov 1.0|1.0  }
   0x2   :  { %v25_v3 = vshrl.u32 %v24_v0, 7  ;;  %v661_v4 = vld [vmem:[%s1320_s0] ss:$0 sm:$0xff]  ;;  %810 = vmatprep.mubr.msk.f32.mxu0 %vm1025_vm0, %v1026_v5  ;;  %885 = vmatprep.mubr.msk.f32.mxu1 %vm1025_vm0, %v1026_v5 }
   0x4   :  { %v26_v6 = vadd.s32 8, %v25_v3  ;;  %vm69_vm1 = vcmp.eq.s32.totalorder %v25_v3, %v1064_v2  ;;  %v27_v7 = vadd.s32 16, %v25_v3  ;;  %v28_v8 = vadd.s32 24, %v25_v3 }
   0x5   :  { %vm37_vm2 = vcmp.eq.s32.totalorder %v25_v3, %v661_v4  ;;  %v29_v9 = vadd.s32 32, %v25_v3  ;;  %v30_v10 = vadd.s32 40, %v25_v3  ;;  %v31_v12 = vadd.s32 48, %v25_v3 }
   0x6   :  { %vm70_vm3 = vcmp.eq.s32.totalorder %v26_v6, %v1064_v2  ;;  %vm71_vm4 = vcmp.eq.s32.totalorder %v27_v7, %v1064_v2  ;;  %vm72_vm5 = vcmp.eq.s32.totalorder %v28_v8, %v1064_v2  ;;  %vm38_vm6 = vcmp.eq.s32.totalorder %v26_v6, %v661_v4 }
   0x7   :  { %vm949_vm7 = vmpackc.low %vm70_vm3, %vm69_vm1  ;;  %vm39_vm9 = vcmp.eq.s32.totalorder %v27_v7, %v661_v4  ;;  %vm40_vm10 = vcmp.eq.s32.totalorder %v28_v8, %v661_v4  ;;  %v32_v13 = vadd.s32 56, %v25_v3  ;;  %vm73_vm12 = vcmp.eq.s32.totalorder %v29_v9, %v1064_v2 }
   0x8   :  { %950 = vmatpush3.bf16.msk.msra.mxu1 %vm949_vm7, %v1027_v11  ;;  %vm952_vm8 = vmpackc.low %vm72_vm5, %vm71_vm4  ;;  %vm74_vm13 = vcmp.eq.s32.totalorder %v30_v10, %v1064_v2  ;;  %vm41_vm15 = vcmp.eq.s32.totalorder %v29_v9, %v661_v4  ;;  %vm42_vm1 = vcmp.eq.s32.totalorder %v30_v10, %v661_v4  ;;  %vm75_vm4 = vcmp.eq.s32.totalorder %v31_v12, %v1064_v2 }
   0x9   :  { %951 = vmatprep.subr.bf16.mxu1 %v1024_v1  ;;  %vm937_vm11 = vmpackc.low %vm38_vm6, %vm37_vm2  ;;  %vm76_vm2 = vcmp.eq.s32.totalorder %v32_v13, %v1064_v2  ;;  %v61_v14 = vadd.s32 64, %v25_v3  ;;  %v62_v15 = vadd.s32 72, %v25_v3  ;;  %vm43_vm7 = vcmp.eq.s32.totalorder %v31_v12, %v661_v4 }
   0xa   :  { %938 = vmatpush3.bf16.msk.msra.mxu0 %vm937_vm11, %v1027_v11  ;;  %vm940_vm14 = vmpackc.low %vm40_vm10, %vm39_vm9  ;;  %vm44_vm9 = vcmp.eq.s32.totalorder %v32_v13, %v661_v4 }
   0xb   :  { %939 = vmatprep.subr.bf16.mxu0 %v1024_v1  ;;  %vm955_vm3 = vmpackc.low %vm74_vm13, %vm73_vm12 }
   0xc   :  { %953 = vmatpush3.bf16.msk.msra.mxu1 %vm952_vm8, %v1027_v11  ;;  %vm943_vm5 = vmpackc.low %vm42_vm1, %vm41_vm15 }
   0xd   :  { %954 = vmatprep.subr.bf16.mxu1 %v1024_v1  ;;  %vm958_vm6 = vmpackc.low %vm76_vm2, %vm75_vm4 }
   0xe   :  { %941 = vmatpush3.bf16.msk.msra.mxu0 %vm940_vm14, %v1027_v11 }
   0xf   :  { %942 = vmatprep.subr.bf16.mxu0 %v1024_v1 }
  0x10   :  { %956 = vmatpush3.bf16.msk.msra.mxu1 %vm955_vm3, %v1027_v11 }
  0x11   :  { %957 = vmatprep.subr.bf16.mxu1 %v1024_v1 }
  0x12   :  { %11 = vsyncpa [#allocation4], 0  ;;  %944 = vmatpush3.bf16.msk.msra.mxu0 %vm943_vm5, %v1027_v11  ;;  %vm77_vm8 = vcmp.eq.s32.totalorder %v61_v14, %v1064_v2  ;;  %vm78_vm10 = vcmp.eq.s32.totalorder %v62_v15, %v1064_v2  ;;  %v63_v16 = vadd.s32 80, %v25_v3  ;;  %v64_v17 = vadd.s32 88, %v25_v3  ;;  %v105_v18 = vld [vmem:[%s1322_s2] sm:$0xff]  ;;  %v106_v19 = vld [vmem:[%s1322_s2 + $0x8] sm:$0xff] }
  0x13   :  { %945 = vmatprep.subr.bf16.mxu0 %v1024_v1  ;;  %vm946_vm11 = vmpackc.low %vm44_vm9, %vm43_vm7  ;;  %vm122_vm15 = vcmask 523264   ;;  %v324_v20 = vld [vmem:[%s1323_s3] sm:$0xff]  ;;  %vm341_vm3 = vcmask 785408   ;;  %v107_v21 = vld [vmem:[%s1322_s2 + $0x10] sm:$0xff]  ;;  %vm562_vm4 = vcmask 15360   ;;  %v1028_v52 = vmov 1.0  }
  0x14   :  { %959 = vmatpush3.bf16.msk.msra.mxu1 %vm958_vm6, %v1027_v11  ;;  %vm961_vm12 = vmpackc.low %vm78_vm10, %vm77_vm8  ;;  %vm79_vm13 = vcmp.eq.s32.totalorder %v63_v16, %v1064_v2  ;;  %vm80_vm14 = vcmp.eq.s32.totalorder %v64_v17, %v1064_v2  ;;  %v325_v22 = vld [vmem:[%s1323_s3 + $0x8] sm:$0xff]  ;;  %v108_v23 = vld [vmem:[%s1322_s2 + $0x18] sm:$0xff]  ;;  %s1029_s9 = smov [#allocation3]  }
  0x15   :  { %960 = vmatprep.subr.bf16.mxu1 %v1024_v1  ;;  %vm964_vm1 = vmpackc.low %vm80_vm14, %vm79_vm13  ;;  %v326_v24 = vld [vmem:[%s1323_s3 + $0x10] sm:$0xff]  ;;  %v109_v25 = vld [vmem:[%s1322_s2 + $0x20] sm:$0xff]  ;;  %s653_s10 = sshll.u32 %s1029_s9, 4  ;;  %s654_s10 = int_to_ptr.vmem [resolvable:$true] %s653_s10 }
  0x16   :  { %947 = vmatpush3.bf16.msk.msra.mxu0 %vm946_vm11, %v1027_v11  ;;  %v327_v26 = vld [vmem:[%s1323_s3 + $0x18] sm:$0xff]  ;;  %v110_v27 = vld [vmem:[%s1322_s2 + $0x28] sm:$0xff]  ;;  %v328_v28 = vld [vmem:[%s1323_s3 + $0x20] sm:$0xff]  ;;  %s1000_s11 = scalar_lea.vmem %s654_s10, 16  ;;  %s1004_s12 = scalar_lea.vmem %s654_s10, 32 }
  0x17   :  { %966 = vmatprep.subr.bf16.mxu0 %v1024_v1  ;;  %v111_v29 = vld [vmem:[%s1322_s2 + $0x30] sm:$0xff]  ;;  %v329_v30 = vld [vmem:[%s1323_s3 + $0x28] sm:$0xff]  ;;  %v112_v31 = vld [vmem:[%s1322_s2 + $0x38] sm:$0xff]  ;;  %p1001_p0 = scmp.ne.s32.totalorder %s654_s10, %s1000_s11  ;;  %p1005_p1 = scmp.lt.s32.totalorder %s654_s10, %s654_s10 }
  0x18   :  { %962 = vmatpush3.bf16.msk.msra.mxu1 %vm961_vm12, %v1027_v11  ;;  %v330_v32 = vld [vmem:[%s1323_s3 + $0x30] sm:$0xff]  ;;  %v113_v33 = vld [vmem:[%s1322_s2 + $0x40] sm:$0xff]  ;;  %v331_v34 = vld [vmem:[%s1323_s3 + $0x38] sm:$0xff]  ;;  %p1006_p2 = scmp.lt.s32.totalorder %s1004_s12, %s1000_s11 }
  0x19   :  { %963 = vmatprep.subr.bf16.mxu1 %v1024_v1  ;;  %811 = vmatmul.mubr.msk.f32.vlgmr.msra.gmra.mrb[0].mxu0 %vm122_vm15, %v105_v18  ;;  %v114_v35 = vld [vmem:[%s1322_s2 + $0x48] sm:$0xff]  ;;  %v332_v36 = vld [vmem:[%s1323_s3 + $0x40] sm:$0xff]  ;;  %v115_v37 = vld [vmem:[%s1322_s2 + $0x50] sm:$0xff] }
  0x1a   :  { %813 = vmatprep.mubr.msk.f32.mxu0 %vm1025_vm0, %v1026_v5  ;;  %v333_v38 = vld [vmem:[%s1323_s3 + $0x48] sm:$0xff]  ;;  %v116_v39 = vld [vmem:[%s1322_s2 + $0x58] sm:$0xff]  ;;  %v334_v40 = vld [vmem:[%s1323_s3 + $0x50] sm:$0xff]  ;;  %p1007_p3 = por %p1006_p2, %p1005_p1 }
  0x1b   :  { %v117_v41 = vld [vmem:[%s1322_s2 + $0x60] sm:$0xff]  ;;  %v335_v42 = vld [vmem:[%s1323_s3 + $0x58] sm:$0xff]  ;;  %v118_v43 = vld [vmem:[%s1322_s2 + $0x68] sm:$0xff] }
  0x1c   :  { %965 = vmatpush3.bf16.msk.msra.mxu1 %vm964_vm1, %v1027_v11  ;;  %v336_v44 = vld [vmem:[%s1323_s3 + $0x60] sm:$0xff]  ;;  %v119_v45 = vld [vmem:[%s1322_s2 + $0x70] sm:$0xff]  ;;  %v337_v46 = vld [vmem:[%s1323_s3 + $0x68] sm:$0xff]  ;;  %p1008_p4 = pnand %p1007_p3, %p1001_p0 }
  0x1d   :  { %814 = vmatmul.mubr.msk.f32.gmra.mrb[2].mxu0 %vm122_vm15, %v106_v19  ;;  %v120_v47 = vld [vmem:[%s1322_s2 + $0x78] sm:$0xff]  ;;  %v338_v48 = vld [vmem:[%s1323_s3 + $0x70] sm:$0xff]  ;;  %v121_v49 = vld [vmem:[%s1322_s2 + $0x80] sm:$0x3] }
  0x1e   :  { %816 = vmatprep.mubr.msk.f32.mxu0 %vm1025_vm0, %v1026_v5  ;;  %v339_v50 = vld [vmem:[%s1323_s3 + $0x78] sm:$0xff]  ;;  %v340_v51 = vld [vmem:[%s1323_s3 + $0x80] sm:$0x3] }
  0x1f   :  { %886 = vmatmul.mubr.msk.f32.vlgmr.msra.gmra.mrb[0].mxu1 %vm341_vm3, %v324_v20 }
  0x20   :  { %888 = vmatprep.mubr.msk.f32.mxu1 %vm1025_vm0, %v1026_v5 }
  0x21   :  { %817 = vmatmul.mubr.msk.f32.gmra.mrb[4].mxu0 %vm122_vm15, %v107_v21 }
  0x22   :  { %819 = vmatprep.mubr.msk.f32.mxu0 %vm1025_vm0, %v1026_v5 }
  0x23   :  { %889 = vmatmul.mubr.msk.f32.gmra.mrb[2].mxu1 %vm341_vm3, %v325_v22 }
  0x24   :  { %891 = vmatprep.mubr.msk.f32.mxu1 %vm1025_vm0, %v1026_v5 }
  0x25   :  { %820 = vmatmul.mubr.msk.f32.gmra.mrb[6].mxu0 %vm122_vm15, %v108_v23 }
  0x26   :  { %822 = vmatprep.mubr.msk.f32.mxu0 %vm1025_vm0, %v1026_v5 }
  0x27   :  { %892 = vmatmul.mubr.msk.f32.gmra.mrb[4].mxu1 %vm341_vm3, %v326_v24 }
  0x28   :  { %894 = vmatprep.mubr.msk.f32.mxu1 %vm1025_vm0, %v1026_v5 }
  0x29   :  { %823 = vmatmul.mubr.msk.f32.gmra.mrb[8].mxu0 %vm122_vm15, %v109_v25 }
  0x2a   :  { %825 = vmatprep.mubr.msk.f32.mxu0 %vm1025_vm0, %v1026_v5 }
  0x2b   :  { %895 = vmatmul.mubr.msk.f32.gmra.mrb[6].mxu1 %vm341_vm3, %v327_v26 }
  0x2c   :  { %897 = vmatprep.mubr.msk.f32.mxu1 %vm1025_vm0, %v1026_v5 }
  0x2d   :  { %826 = vmatmul.mubr.msk.f32.gmra.mrb[10].mxu0 %vm122_vm15, %v110_v27 }
  0x2e   :  { %828 = vmatprep.mubr.msk.f32.mxu0 %vm1025_vm0, %v1026_v5 }
  0x2f   :  { %898 = vmatmul.mubr.msk.f32.gmra.mrb[8].mxu1 %vm341_vm3, %v328_v28 }
  0x30   :  { %900 = vmatprep.mubr.msk.f32.mxu1 %vm1025_vm0, %v1026_v5 }
  0x31   :  { %829 = vmatmul.mubr.msk.f32.gmra.mrb[12].mxu0 %vm122_vm15, %v111_v29 }
  0x32   :  { %831 = vmatprep.mubr.msk.f32.mxu0 %vm1025_vm0, %v1026_v5 }
  0x33   :  { %901 = vmatmul.mubr.msk.f32.gmra.mrb[10].mxu1 %vm341_vm3, %v329_v30 }
  0x34   :  { %903 = vmatprep.mubr.msk.f32.mxu1 %vm1025_vm0, %v1026_v5 }
  0x35   :  { %832 = vmatmul.mubr.msk.f32.gmra.mrb[14].mxu0 %vm122_vm15, %v112_v31 }
  0x36   :  { %834 = vmatprep.mubr.msk.f32.mxu0 %vm1025_vm0, %v1026_v5 }
  0x37   :  { %904 = vmatmul.mubr.msk.f32.gmra.mrb[12].mxu1 %vm341_vm3, %v330_v32 }
  0x38   :  { %906 = vmatprep.mubr.msk.f32.mxu1 %vm1025_vm0, %v1026_v5 }
  0x39   :  { %835 = vmatmul.mubr.msk.f32.gmra.mrb[16].mxu0 %vm122_vm15, %v113_v33 }
  0x3a   :  { %837 = vmatprep.mubr.msk.f32.mxu0 %vm1025_vm0, %v1026_v5 }
  0x3b   :  { %907 = vmatmul.mubr.msk.f32.gmra.mrb[14].mxu1 %vm341_vm3, %v331_v34 }
  0x3c   :  { %909 = vmatprep.mubr.msk.f32.mxu1 %vm1025_vm0, %v1026_v5 }
  0x3d   :  { %838 = vmatmul.mubr.msk.f32.gmra.mrb[18].mxu0 %vm122_vm15, %v114_v35 }
  0x3e   :  { %840 = vmatprep.mubr.msk.f32.mxu0 %vm1025_vm0, %v1026_v5 }
  0x3f   :  { %910 = vmatmul.mubr.msk.f32.gmra.mrb[16].mxu1 %vm341_vm3, %v332_v36 }
  0x40   :  { %912 = vmatprep.mubr.msk.f32.mxu1 %vm1025_vm0, %v1026_v5 }
  0x41   :  { %841 = vmatmul.mubr.msk.f32.gmra.mrb[20].mxu0 %vm122_vm15, %v115_v37 }
  0x42   :  { %843 = vmatprep.mubr.msk.f32.mxu0 %vm1025_vm0, %v1026_v5 }
  0x43   :  { %913 = vmatmul.mubr.msk.f32.gmra.mrb[18].mxu1 %vm341_vm3, %v333_v38 }
  0x44   :  { %915 = vmatprep.mubr.msk.f32.mxu1 %vm1025_vm0, %v1026_v5 }
  0x45   :  { %844 = vmatmul.mubr.msk.f32.gmra.mrb[22].mxu0 %vm122_vm15, %v116_v39 }
  0x46   :  { %846 = vmatprep.mubr.msk.f32.mxu0 %vm1025_vm0, %v1026_v5 }
  0x47   :  { %916 = vmatmul.mubr.msk.f32.gmra.mrb[20].mxu1 %vm341_vm3, %v334_v40 }
  0x48   :  { %918 = vmatprep.mubr.msk.f32.mxu1 %vm1025_vm0, %v1026_v5 }
  0x49   :  { %847 = vmatmul.mubr.msk.f32.gmra.mrb[24].mxu0 %vm122_vm15, %v117_v41 }
  0x4a   :  { %849 = vmatprep.mubr.msk.f32.mxu0 %vm1025_vm0, %v1026_v5 }
  0x4b   :  { %919 = vmatmul.mubr.msk.f32.gmra.mrb[22].mxu1 %vm341_vm3, %v335_v42 }
  0x4c   :  { %921 = vmatprep.mubr.msk.f32.mxu1 %vm1025_vm0, %v1026_v5 }
  0x4d   :  { %850 = vmatmul.mubr.msk.f32.gmra.mrb[26].mxu0 %vm122_vm15, %v118_v43 }
  0x4e   :  { %852 = vmatprep.mubr.msk.f32.mxu0 %vm1025_vm0, %v1026_v5 }
  0x4f   :  { %922 = vmatmul.mubr.msk.f32.gmra.mrb[24].mxu1 %vm341_vm3, %v336_v44 }
  0x50   :  { %924 = vmatprep.mubr.msk.f32.mxu1 %vm1025_vm0, %v1026_v5 }
  0x51   :  { %853 = vmatmul.mubr.msk.f32.gmra.mrb[28].mxu0 %vm122_vm15, %v119_v45 }
  0x52   :  { %855 = vmatprep.mubr.msk.f32.mxu0 %vm1025_vm0, %v1026_v5 }
  0x53   :  { %925 = vmatmul.mubr.msk.f32.gmra.mrb[26].mxu1 %vm341_vm3, %v337_v46 }
  0x54   :  { %927 = vmatprep.mubr.msk.f32.mxu1 %vm1025_vm0, %v1026_v5 }
  0x55   :  { %856 = vmatmul.mubr.msk.f32.gmra.mrb[30].mxu0 %vm122_vm15, %v120_v47 }
  0x56   :  { %858 = vmatprep.mubr.msk.f32.mxu0 %vm1025_vm0, %v1026_v5 }
  0x57   :  { %928 = vmatmul.mubr.msk.f32.gmra.mrb[28].mxu1 %vm341_vm3, %v338_v48 }
  0x58   :  { %930 = vmatprep.mubr.msk.f32.mxu1 %vm1025_vm0, %v1026_v5 }
  0x59   :  { %859 = vmatmul.mubr.msk.f32.gmra.mrb[32].mxu0 %vm122_vm15, %v121_v49 }
  0x5a   :  { %738 = vmatprep.mubr.msk.f32.mxu0 %vm562_vm4, %v1028_v52 }
  0x5b   :  { %931 = vmatmul.mubr.msk.f32.gmra.mrb[30].mxu1 %vm341_vm3, %v339_v50 }
  0x5c   :  { %933 = vmatprep.mubr.msk.f32.mxu1 %vm1025_vm0, %v1026_v5  ;;  %vm566_vm0 = vcmask 1041408  }
  0x5f   :  { %934 = vmatmul.mubr.msk.f32.gmra.mrb[32].mxu1 %vm341_vm3, %v340_v51 }
  0xec   :  { %v240_v53 = vpop.f32.mrb[0].mxu0 }
  0xed   :  { %v812_v54 = vpop.f32.mrb[1].mxu0 }
  0xf0   :  { %v245_v55 = vpop.f32.mrb[2].mxu0 }
  0xf1   :  { %v815_v56 = vpop.f32.mrb[3].mxu0 }
  0xf2   :  { %v459_v57 = vpop.f32.mrb[0].mxu1 }
  0xf3   :  { %v543_v58 = vmul.f32 %v459_v57, %v240_v53  ;;  %v887_v59 = vpop.f32.mrb[1].mxu1 }
  0xf4   :  { %v250_v60 = vpop.f32.mrb[4].mxu0 }
  0xf5   :  { %v818_v61 = vpop.f32.mrb[5].mxu0 }
  0xf6   :  { %v464_v62 = vpop.f32.mrb[2].mxu1 }
  0xf7   :  { %v544_v63 = vmul.f32 %v464_v62, %v245_v55  ;;  %v890_v0 = vpop.f32.mrb[3].mxu1 }
  0xf8   :  { %v255_v2 = vpop.f32.mrb[6].mxu0 }
  0xf9   :  { %v967_v3 = vpack.c.bf16 %v544_v63, %v543_v58  ;;  %v821_v4 = vpop.f32.mrb[7].mxu0 }
  0xfa   :  { %v469_v6 = vpop.f32.mrb[4].mxu1 }
  0xfb   :  { %v545_v7 = vmul.f32 %v469_v6, %v250_v60  ;;  %v893_v8 = vpop.f32.mrb[5].mxu1  ;;  %968 = vmatpush1.bf16.msra.mxu0 %v967_v3 }
  0xfc   :  { %v260_v9 = vpop.f32.mrb[8].mxu0  ;;  %969 = vmatprep.subr.bf16.mxu0 %v1024_v1 }
  0xfd   :  { %v824_v10 = vpop.f32.mrb[9].mxu0 }
  0xfe   :  { %v474_v11 = vpop.f32.mrb[6].mxu1 }
  0xff   :  { %v546_v12 = vmul.f32 %v474_v11, %v255_v2  ;;  %v896_v13 = vpop.f32.mrb[7].mxu1 }
 0x100   :  { %v265_v14 = vpop.f32.mrb[10].mxu0 }
 0x101   :  { %v970_v15 = vpack.c.bf16 %v546_v12, %v545_v7  ;;  %v827_v16 = vpop.f32.mrb[11].mxu0 }
 0x102   :  { %v479_v17 = vpop.f32.mrb[8].mxu1 }
 0x103   :  { %v547_v18 = vmul.f32 %v479_v17, %v260_v9  ;;  %v899_v19 = vpop.f32.mrb[9].mxu1  ;;  %971 = vmatpush1.bf16.msra.mxu0 %v970_v15 }
 0x104   :  { %v270_v20 = vpop.f32.mrb[12].mxu0  ;;  %972 = vmatprep.subr.bf16.mxu0 %v1024_v1 }
 0x105   :  { %v830_v21 = vpop.f32.mrb[13].mxu0 }
 0x106   :  { %v484_v22 = vpop.f32.mrb[10].mxu1 }
 0x107   :  { %v548_v23 = vmul.f32 %v484_v22, %v265_v14  ;;  %v902_v24 = vpop.f32.mrb[11].mxu1 }
 0x108   :  { %v275_v25 = vpop.f32.mrb[14].mxu0 }
 0x109   :  { %v973_v26 = vpack.c.bf16 %v548_v23, %v547_v18  ;;  %v833_v27 = vpop.f32.mrb[15].mxu0 }
 0x10a   :  { %v489_v28 = vpop.f32.mrb[12].mxu1 }
 0x10b   :  { %v549_v29 = vmul.f32 %v489_v28, %v270_v20  ;;  %v905_v30 = vpop.f32.mrb[13].mxu1  ;;  %974 = vmatpush1.bf16.msra.mxu0 %v973_v26 }
 0x10c   :  { %v280_v31 = vpop.f32.mrb[16].mxu0  ;;  %975 = vmatprep.subr.bf16.mxu0 %v1024_v1 }
 0x10d   :  { %v836_v32 = vpop.f32.mrb[17].mxu0 }
 0x10e   :  { %v494_v33 = vpop.f32.mrb[14].mxu1 }
 0x10f   :  { %v550_v34 = vmul.f32 %v494_v33, %v275_v25  ;;  %v908_v35 = vpop.f32.mrb[15].mxu1 }
 0x110   :  { %v285_v36 = vpop.f32.mrb[18].mxu0 }
 0x111   :  { %v976_v37 = vpack.c.bf16 %v550_v34, %v549_v29  ;;  %v839_v38 = vpop.f32.mrb[19].mxu0 }
 0x112   :  { %v499_v39 = vpop.f32.mrb[16].mxu1 }
 0x113   :  { %v551_v40 = vmul.f32 %v499_v39, %v280_v31  ;;  %v911_v41 = vpop.f32.mrb[17].mxu1  ;;  %977 = vmatpush1.bf16.msra.mxu0 %v976_v37 }
 0x114   :  { %v290_v42 = vpop.f32.mrb[20].mxu0  ;;  %978 = vmatprep.subr.bf16.mxu0 %v1024_v1 }
 0x115   :  { %v842_v43 = vpop.f32.mrb[21].mxu0 }
 0x116   :  { %v504_v44 = vpop.f32.mrb[18].mxu1 }
 0x117   :  { %v552_v45 = vmul.f32 %v504_v44, %v285_v36  ;;  %v914_v46 = vpop.f32.mrb[19].mxu1 }
 0x118   :  { %v295_v47 = vpop.f32.mrb[22].mxu0 }
 0x119   :  { %v979_v48 = vpack.c.bf16 %v552_v45, %v551_v40  ;;  %v845_v49 = vpop.f32.mrb[23].mxu0 }
 0x11a   :  { %v509_v50 = vpop.f32.mrb[20].mxu1 }
 0x11b   :  { %v553_v51 = vmul.f32 %v509_v50, %v290_v42  ;;  %v917_v53 = vpop.f32.mrb[21].mxu1  ;;  %980 = vmatpush1.bf16.msra.mxu0 %v979_v48 }
 0x11c   :  { %v300_v54 = vpop.f32.mrb[24].mxu0  ;;  %981 = vmatprep.subr.bf16.mxu0 %v1024_v1 }
 0x11d   :  { %v848_v55 = vpop.f32.mrb[25].mxu0 }
 0x11e   :  { %v514_v56 = vpop.f32.mrb[22].mxu1 }
 0x11f   :  { %v554_v57 = vmul.f32 %v514_v56, %v295_v47  ;;  %v920_v58 = vpop.f32.mrb[23].mxu1 }
 0x120   :  { %v305_v59 = vpop.f32.mrb[26].mxu0 }
 0x121   :  { %v982_v60 = vpack.c.bf16 %v554_v57, %v553_v51  ;;  %v851_v61 = vpop.f32.mrb[27].mxu0 }
 0x122   :  { %v519_v62 = vpop.f32.mrb[24].mxu1 }
 0x123   :  { %v555_v63 = vmul.f32 %v519_v62, %v300_v54  ;;  %v923_v0 = vpop.f32.mrb[25].mxu1  ;;  %983 = vmatpush1.bf16.msra.mxu0 %v982_v60 }
 0x124   :  { %v310_v2 = vpop.f32.mrb[28].mxu0  ;;  %984 = vmatprep.subr.bf16.mxu0 %v1024_v1 }
 0x125   :  { %v854_v3 = vpop.f32.mrb[29].mxu0 }
 0x126   :  { %v524_v4 = vpop.f32.mrb[26].mxu1 }
 0x127   :  { %v556_v6 = vmul.f32 %v524_v4, %v305_v59  ;;  %v926_v7 = vpop.f32.mrb[27].mxu1 }
 0x128   :  { %v315_v8 = vpop.f32.mrb[30].mxu0 }
 0x129   :  { %v985_v9 = vpack.c.bf16 %v556_v6, %v555_v63  ;;  %v857_v10 = vpop.f32.mrb[31].mxu0 }
 0x12a   :  { %v529_v11 = vpop.f32.mrb[28].mxu1 }
 0x12b   :  { %v557_v12 = vmul.f32 %v529_v11, %v310_v2  ;;  %v929_v13 = vpop.f32.mrb[29].mxu1  ;;  %986 = vmatpush1.bf16.msra.mxu0 %v985_v9 }
 0x12c   :  { %987 = vmatprep.subr.bf16.mxu0 %v1024_v1  ;;  %v320_v14 = vpop.f32.mrb[32].mxu0  ;;  %v561_v1 = vstv %s1324_s4 }
 0x12d   :  { %v860_v15 = vpop.f32.mrb[33].mxu0 }
 0x12e   :  { %v534_v16 = vpop.f32.mrb[30].mxu1 }
 0x12f   :  { %v558_v17 = vmul.f32 %v534_v16, %v315_v8  ;;  %v932_v18 = vpop.f32.mrb[31].mxu1 }
 0x131   :  { %v988_v19 = vpack.c.bf16 %v558_v17, %v557_v12 }
 0x132   :  { %v539_v20 = vpop.f32.mrb[32].mxu1 }
 0x133   :  { %989 = vmatpush1.bf16.msra.mxu0 %v988_v19  ;;  %v559_v21 = vmul.f32 %v539_v20, %v320_v14  ;;  %v935_v22 = vpop.f32.mrb[33].mxu1 }
 0x134   :  { %602 = vmatprep.subr.mxu0 %v1026_v5 }
 0x137   :  { %737 = vmatpush1.msk.msra.mxu0 %vm566_vm0, %v559_v21 }
 0x138   :  { %635 = vmatmul.mubr.f32.vlgmr.msra.gmra.mrb[34].mxu0 %v1028_v52 }
 0x20b   :  { %v636_v23 = vpop.f32.mrb[34].mxu0 }
 0x20c   :  { %v637_v24 = vadd.f32 %v636_v23, %v561_v1  ;;  %v638_v25 = vpop.f32.mrb[35].mxu0 }
 0x20e   :  { %v739_v26 = vmul.f32 -1.442695, %v637_v24 }
 0x210   :  { %996 = vpow2.f32 %v739_v26 }
 0x21a   :  { %v997_v27 = vpop.eup %996 }
 0x21b   :  { %v643_v28 = vadd.f32 1.0, %v997_v27 }
 0x21d   :  { %998 = vrcp.f32 %v643_v28 }
 0x227   :  { %v999_v5 = vpop.eup %998 }
 0x228   :  { %646 = vst [vmem:[#allocation3] sm:$0x1] %v999_v5 }
 0x229   :  { %1011 = shalt.err (!%p1008_p4)
}
 0x22a   :  { %s1012_s14 = scalar_lea.hbm %s1325_s5, 16 }
 0x22b   :  { %p1013_p5 = scmp.ne.s32.totalorder %s1325_s5, %s1012_s14  ;;  %p1016_p6 = scmp.lt.u32.totalorder %s1012_s14, %s1325_s5 }
 0x22d   :  { %p1018_p7 = pnand %p1016_p6, %p1013_p5 }
 0x22f   :  { %1021 = shalt.err (!%p1018_p7)
}
 0x230   :  { %656 = dma.vmem_to_hbm [thread:$0]  %s654_s10, 16, %s1325_s5, [#allocation4]  }
 0x231   :  { %1022 = dma.done.wait [#allocation4], 16  }
 0x232   :  { %1023 = vsyncadd [#allocation4], 4294967280 }
 0x233   :  { %660 = vsyncpa [#allocation4], 1 }

</bundles_post_ra>
